<compile_context>
chip_gen: v7x
topology: tpu7x:2x2x1
jax: 0.10.0
libtpu: 0.0.40
codegen_flags: <defaults>
</compile_context>

<pallas_src>
import jax
import jax.numpy as jnp
from jax import lax
from jax.experimental import pallas as pl
from jax.experimental.pallas import tpu as pltpu

LANES = 128
SUBLANES = 8
PAD_LOGIT = -1.0e4   # sigmoid(PAD_LOGIT) == 0 exactly in f32; with target 0 a
                     # padded/masked element contributes exactly 0 to all sums.


def _cdiv(a, b):
    return -(-a // b)


def _round_up(a, m):
    return _cdiv(a, m) * m


def _tpu_defaults():
    """(ncores, max_block_rows, vmem_limit_bytes) tuned per TPU generation."""
    kind = ""
    try:
        kind = jax.devices()[0].device_kind.lower()
    except Exception:
        pass
    if "v7" in kind:
        # 2 TensorCores/chip, only 64 MiB physical VMEM.
        return 2, 4096, 48 * 1024 * 1024
    if "v5" in kind:
        # Single TC; default scoped VMEM is 16 MiB (128 MiB physical).
        return 1, 2048, 32 * 1024 * 1024
    if "v2" in kind or "v3" in kind:
        return 1, 1024, None
    # v4 / v6e / unknown: single TC, plenty of VMEM.
    return 1, 4096, 48 * 1024 * 1024


def _make_dice_bce_kernel(block_rows, steps, ncores, valid_rows, covered_rows):
    need_mask = valid_rows < covered_rows
    # Rows of real data inside the globally-last block (only used if masking).
    tail_rows = valid_rows - (ncores * steps - 1) * block_rows

    def accumulate(acc_ref, x, t):
        # Logit-space math: one exp + one log1p (EUP) per element instead of
        # sigmoid + log + log1p, preserving F.binary_cross_entropy's exact
        # clamp-log-at(-100) semantics.
        e = jnp.exp(-jnp.abs(x))                        # exp(-|x|) in (0, 1]
        sp_pos = jnp.maximum(x, 0.0) + jnp.log1p(e)     # softplus(x)  = log(1+e^x)
        sp_neg = sp_pos - x                             # softplus(-x) = log(1+e^-x)
        log_p = -jnp.minimum(sp_neg, 100.0)             # max(log sigmoid(x), -100)
        log_1mp = -jnp.minimum(sp_pos, 100.0)           # max(log(1-sigmoid(x)), -100)
        r = 1.0 / (1.0 + e)                             # exact reciprocal (sigmoid parity)
        p = jnp.where(x >= 0.0, r, 1.0 - r)             # sigmoid(x), numerically stable
        bce = -(t * log_p + (1.0 - t) * log_1mp)

        def vsum(v):
            # (block_rows, 128) -> (8, 128): pure vreg-wise VPU adds, no XLU.
            return jnp.sum(v.reshape(-1, SUBLANES, LANES), axis=0)

        acc_ref[0] += vsum(p * t)
        acc_ref[1] += vsum(p)
        acc_ref[2] += vsum(t)
        acc_ref[3] += vsum(bce)

    def kernel(x_ref, t_ref, acc_ref):
        c = pl.program_id(0)
        i = pl.program_id(1)

        @pl.when(i == 0)
        def _():
            acc_ref[...] = jnp.zeros_like(acc_ref)

        x = x_ref[...].astype(jnp.float32)
        t = t_ref[...].astype(jnp.float32)

        if need_mask:
            # Only the globally-last block is partial; every other block is
            # fully valid, so the hot loop stays mask-free.
            is_tail = jnp.logical_and(c == ncores - 1, i == steps - 1)

            @pl.when(jnp.logical_not(is_tail))
            def _():
                accumulate(acc_ref, x, t)

            @pl.when(is_tail)
            def _():
                row = lax.broadcasted_iota(jnp.int32, (block_rows, LANES), 0)
                m = row < tail_rows
                # Mask BEFORE the transcendentals: rows past the end of the
                # data hold uninitialized VMEM and must not NaN-propagate.
                accumulate(acc_ref,
                           jnp.where(m, x, PAD_LOGIT),
                           jnp.where(m, t, 0.0))
        else:
            accumulate(acc_ref, x, t)

    return kernel


def dice_bce_loss(inputs, targets, smooth=1.0):
    """Pallas TPU version of DiceBCELoss.forward(inputs, targets, smooth).

    `inputs` are logits, `targets` are labels in [0, 1]; any shape.  Narrow
    dtypes (bf16 logits, bf16/int targets) are fine: the f32 cast happens
    inside the kernel, so HBM traffic stays at the input width.
    """
    n = int(inputs.size)
    ncores_hw, max_block_rows, vmem_limit = _tpu_defaults()

    rows = _cdiv(n, LANES)

    # Split across TensorCores only when there is enough work to pay for it.
    ncores = ncores_hw if rows >= 4 * ncores_hw * SUBLANES else 1

    # Block rows: multiple of 8, <= rows where possible, <= per-generation max,
    # and roughly rows / (ncores * steps) so cores stay balanced.
    steps0 = _cdiv(_cdiv(rows, ncores), max_block_rows)
    block_rows = max(
        SUBLANES,
        min(max_block_rows,
            (rows // SUBLANES) * SUBLANES,
            _round_up(_cdiv(rows, ncores * steps0), SUBLANES)),
    )
    steps = _cdiv(_cdiv(rows, block_rows), ncores)
    nblocks = ncores * steps
    covered_rows = nblocks * block_rows

    # A wrapper-side pad copy is only needed in rare ragged corner cases:
    #   (a) n is not 128-aligned (the free reshape is impossible);
    #   (b) the data is smaller than a single (8, 128) tile;
    #   (c) a block other than the globally-last one would fall (partially or
    #       fully) outside the data (only possible for uneven v7x core splits).
    only_last_partial = (nblocks - 1) * block_rows < rows
    pad_needed = (n % LANES != 0) or (rows < SUBLANES) or (not only_last_partial)

    flat_x = inputs.reshape(-1)
    flat_t = targets.reshape(-1)
    if pad_needed:
        n_pad = covered_rows * LANES - n
        flat_x = jnp.pad(flat_x, (0, n_pad), constant_values=PAD_LOGIT)
        flat_t = jnp.pad(flat_t, (0, n_pad), constant_values=0)
        data_rows = covered_rows
    else:
        data_rows = rows

    x2 = flat_x.reshape(data_rows, LANES)
    t2 = flat_t.reshape(data_rows, LANES)

    kernel = _make_dice_bce_kernel(block_rows, steps, ncores, data_rows,
                                   covered_rows)

    in_map = lambda c, i: (c * steps + i, 0)
    cp_kwargs = dict(dimension_semantics=("parallel", "arbitrary"))
    if vmem_limit is not None:
        cp_kwargs["vmem_limit_bytes"] = vmem_limit

    partials = pl.pallas_call(
        kernel,
        out_shape=jax.ShapeDtypeStruct((ncores * 4, SUBLANES, LANES),
                                       jnp.float32),
        grid_spec=pltpu.PrefetchScalarGridSpec(
            num_scalar_prefetch=0,
            grid=(ncores, steps),
            in_specs=[
                pl.BlockSpec((block_rows, LANES), in_map),
                pl.BlockSpec((block_rows, LANES), in_map),
            ],
            out_specs=pl.BlockSpec((4, SUBLANES, LANES), lambda c, i: (c, 0, 0)),
        ),
        compiler_params=pltpu.CompilerParams(**cp_kwargs),
    )(x2, t2)

    # Tiny finalize in plain JAX: collapse the per-core lane-wise partials.
    sums = jnp.sum(partials.reshape(ncores, 4, SUBLANES * LANES), axis=(0, 2))
    intersection, p_sum, t_sum, bce_sum = sums[0], sums[1], sums[2], sums[3]

    dice_loss = 1.0 - (2.0 * intersection + smooth) / (p_sum + t_sum + smooth)
    bce_mean = bce_sum / jnp.float32(n)
    return bce_mean + dice_loss


def _reference_dice_bce(inputs, targets, smooth=1.0):
    p = jax.nn.sigmoid(inputs.astype(jnp.float32)).reshape(-1)
    t = targets.astype(jnp.float32).reshape(-1)
    intersection = jnp.sum(p * t)
    dice_loss = 1.0 - (2.0 * intersection + smooth) / (jnp.sum(p) + jnp.sum(t) + smooth)
    log_p = jnp.maximum(jnp.log(p), -100.0)
    log_1mp = jnp.maximum(jnp.log1p(-p), -100.0)
    bce = jnp.mean(-(t * log_p + (1.0 - t) * log_1mp))
    return bce + dice_loss


if __name__ == "__main__":
    key = jax.random.PRNGKey(0)

    def _make_inputs(k, shape):
        k1, k2 = jax.random.split(k)
        x = jax.random.normal(k1, shape, dtype=jnp.float32)
        t = (jax.random.uniform(k2, shape) > 0.5).astype(jnp.float32)
        return x, t

    # Main shape (clean, fully-aligned path): NCHW logits + binary targets.
    k0, k1, k2 = jax.random.split(key, 3)
    x, t = _make_inputs(k0, (2, 4, 16, 16))
    loss = jax.block_until_ready(dice_bce_loss(x, t, smooth=1.0))
    ref = _reference_dice_bce(x, t, smooth=1.0)
    assert jnp.allclose(loss, ref, rtol=1e-5, atol=1e-5), (loss, ref)

    # Exercise the copy-free masked-tail path (rows not block-aligned).
    x, t = _make_inputs(k1, (2, 3, 16, 16))
    loss = jax.block_until_ready(dice_bce_loss(x, t, smooth=1.0))
    ref = _reference_dice_bce(x, t, smooth=1.0)
    assert jnp.allclose(loss, ref, rtol=1e-5, atol=1e-5), (loss, ref)

    # Exercise the rare sentinel-pad fallback (n not 128-aligned, tiny).
    x, t = _make_inputs(k2, (2, 3, 5, 7))
    loss = jax.block_until_ready(dice_bce_loss(x, t, smooth=1.0))
    ref = _reference_dice_bce(x, t, smooth=1.0)
    assert jnp.allclose(loss, ref, rtol=1e-5, atol=1e-5), (loss, ref)

    print("KERNEL_OK")
</pallas_src>

<mosaic_0001>
module attributes {stable_mosaic.version = 11 : i64} {
  func.func @kernel(%arg0: i32, %arg1: i32, %arg2: memref<16x128xf32, #tpu.memory_space<vmem>>, %arg3: memref<16x128xf32, #tpu.memory_space<vmem>>, %arg4: memref<4x8x128xf32, #tpu.memory_space<vmem>>) attributes {dimension_semantics = [#tpu.dimension_semantics<parallel>, #tpu.dimension_semantics<arbitrary>], iteration_bounds = array<i64: 1, 1>, scalar_prefetch = 0 : i64, scratch_operands = 0 : i64, tpu.core_type = #tpu.core_type<tc>, window_params = [{transform_indices = @transform_0, window_bounds = array<i64: 16, 128>}, {transform_indices = @transform_1, window_bounds = array<i64: 16, 128>}, {transform_indices = @transform_2, window_bounds = array<i64: 4, 8, 128>}]} {
    %c0_i32 = arith.constant 0 : i32
    %0 = arith.cmpi eq, %arg1, %c0_i32 : i32
    %1 = arith.extui %0 : i1 to i32
    %c0_i32_0 = arith.constant 0 : i32
    %2 = arith.cmpi ne, %1, %c0_i32_0 : i32
    scf.if %2 {
      %cst_40 = arith.constant 0.000000e+00 : f32
      %71 = vector.broadcast %cst_40 : f32 to vector<4x8x128xf32>
      %c0_41 = arith.constant 0 : index
      %c0_42 = arith.constant 0 : index
      %c0_43 = arith.constant 0 : index
      %72 = vector.load %arg4[%c0_41, %c0_42, %c0_43] : memref<4x8x128xf32, #tpu.memory_space<vmem>>, vector<4x8x128xf32>
      tpu.vector_store %arg4[%c0_41, %c0_42, %c0_43], %71 {strides = array<i32>} : memref<4x8x128xf32, #tpu.memory_space<vmem>>, vector<4x8x128xf32>,
    } else {
    }
    %c0 = arith.constant 0 : index
    %c0_1 = arith.constant 0 : index
    %3 = vector.load %arg2[%c0, %c0_1] : memref<16x128xf32, #tpu.memory_space<vmem>>, vector<16x128xf32>
    %c0_2 = arith.constant 0 : index
    %c0_3 = arith.constant 0 : index
    %4 = vector.load %arg3[%c0_2, %c0_3] : memref<16x128xf32, #tpu.memory_space<vmem>>, vector<16x128xf32>
    %5 = math.absf %3 : vector<16x128xf32>
    %cst = arith.constant 0.000000e+00 : f32
    %6 = vector.broadcast %cst : f32 to vector<16x128xf32>
    %7 = arith.subf %6, %5 : vector<16x128xf32>
    %8 = math.exp %7 : vector<16x128xf32>
    %cst_4 = arith.constant 0.000000e+00 : f32
    %9 = vector.broadcast %cst_4 : f32 to vector<16x128xf32>
    %10 = arith.maximumf %3, %9 : vector<16x128xf32>
    %11 = math.log1p %8 : vector<16x128xf32>
    %12 = arith.addf %10, %11 : vector<16x128xf32>
    %13 = arith.subf %12, %3 : vector<16x128xf32>
    %cst_5 = arith.constant 1.000000e+02 : f32
    %14 = vector.broadcast %cst_5 : f32 to vector<16x128xf32>
    %15 = arith.minimumf %13, %14 : vector<16x128xf32>
    %cst_6 = arith.constant 0.000000e+00 : f32
    %16 = vector.broadcast %cst_6 : f32 to vector<16x128xf32>
    %17 = arith.subf %16, %15 : vector<16x128xf32>
    %cst_7 = arith.constant 1.000000e+02 : f32
    %18 = vector.broadcast %cst_7 : f32 to vector<16x128xf32>
    %19 = arith.minimumf %12, %18 : vector<16x128xf32>
    %cst_8 = arith.constant 0.000000e+00 : f32
    %20 = vector.broadcast %cst_8 : f32 to vector<16x128xf32>
    %21 = arith.subf %20, %19 : vector<16x128xf32>
    %cst_9 = arith.constant 1.000000e+00 : f32
    %22 = vector.broadcast %cst_9 : f32 to vector<16x128xf32>
    %23 = arith.addf %22, %8 : vector<16x128xf32>
    %cst_10 = arith.constant 1.000000e+00 : f32
    %24 = vector.broadcast %cst_10 : f32 to vector<16x128xf32>
    %25 = arith.divf %24, %23 : vector<16x128xf32>
    %cst_11 = arith.constant 0.000000e+00 : f32
    %26 = vector.broadcast %cst_11 : f32 to vector<16x128xf32>
    %27 = arith.cmpf oge, %3, %26 : vector<16x128xf32>
    %cst_12 = arith.constant 1.000000e+00 : f32
    %28 = vector.broadcast %cst_12 : f32 to vector<16x128xf32>
    %29 = arith.subf %28, %25 : vector<16x128xf32>
    %30 = arith.select %27, %25, %29 : vector<16x128xi1>, vector<16x128xf32>
    %31 = arith.mulf %4, %17 : vector<16x128xf32>
    %cst_13 = arith.constant 1.000000e+00 : f32
    %32 = vector.broadcast %cst_13 : f32 to vector<16x128xf32>
    %33 = arith.subf %32, %4 : vector<16x128xf32>
    %34 = arith.mulf %33, %21 : vector<16x128xf32>
    %35 = arith.addf %31, %34 : vector<16x128xf32>
    %cst_14 = arith.constant 0.000000e+00 : f32
    %36 = vector.broadcast %cst_14 : f32 to vector<16x128xf32>
    %37 = arith.subf %36, %35 : vector<16x128xf32>
    %c0_15 = arith.constant 0 : index
    %c0_16 = arith.constant 0 : index
    %c0_17 = arith.constant 0 : index
    %38 = vector.load %arg4[%c0_15, %c0_16, %c0_17] : memref<4x8x128xf32, #tpu.memory_space<vmem>>, vector<1x8x128xf32>
    %39 = vector.shape_cast %38 : vector<1x8x128xf32> to vector<8x128xf32>
    %40 = arith.mulf %30, %4 : vector<16x128xf32>
    %41 = vector.shape_cast %40 : vector<16x128xf32> to vector<2x8x128xf32>
    %cst_18 = arith.constant dense<0.000000e+00> : vector<8x128xf32>
    %42 = vector.multi_reduction <add>, %41, %cst_18 [0] : vector<2x8x128xf32> to vector<8x128xf32>
    %43 = arith.addf %39, %42 : vector<8x128xf32>
    %c0_19 = arith.constant 0 : index
    %c0_20 = arith.constant 0 : index
    %c0_21 = arith.constant 0 : index
    %44 = vector.load %arg4[%c0_19, %c0_20, %c0_21] : memref<4x8x128xf32, #tpu.memory_space<vmem>>, vector<1x8x128xf32>
    %45 = vector.shape_cast %44 : vector<1x8x128xf32> to vector<8x128xf32>
    %46 = vector.shape_cast %43 : vector<8x128xf32> to vector<1x8x128xf32>
    tpu.vector_store %arg4[%c0_19, %c0_20, %c0_21], %46 {strides = array<i32>} : memref<4x8x128xf32, #tpu.memory_space<vmem>>, vector<1x8x128xf32>,
    %c1 = arith.constant 1 : index
    %c0_22 = arith.constant 0 : index
    %c0_23 = arith.constant 0 : index
    %47 = vector.load %arg4[%c1, %c0_22, %c0_23] : memref<4x8x128xf32, #tpu.memory_space<vmem>>, vector<1x8x128xf32>
    %48 = vector.shape_cast %47 : vector<1x8x128xf32> to vector<8x128xf32>
    %49 = vector.shape_cast %30 : vector<16x128xf32> to vector<2x8x128xf32>
    %cst_24 = arith.constant dense<0.000000e+00> : vector<8x128xf32>
    %50 = vector.multi_reduction <add>, %49, %cst_24 [0] : vector<2x8x128xf32> to vector<8x128xf32>
    %51 = arith.addf %48, %50 : vector<8x128xf32>
    %c1_25 = arith.constant 1 : index
    %c0_26 = arith.constant 0 : index
    %c0_27 = arith.constant 0 : index
    %52 = vector.load %arg4[%c1_25, %c0_26, %c0_27] : memref<4x8x128xf32, #tpu.memory_space<vmem>>, vector<1x8x128xf32>
    %53 = vector.shape_cast %52 : vector<1x8x128xf32> to vector<8x128xf32>
    %54 = vector.shape_cast %51 : vector<8x128xf32> to vector<1x8x128xf32>
    tpu.vector_store %arg4[%c1_25, %c0_26, %c0_27], %54 {strides = array<i32>} : memref<4x8x128xf32, #tpu.memory_space<vmem>>, vector<1x8x128xf32>,
    %c2 = arith.constant 2 : index
    %c0_28 = arith.constant 0 : index
    %c0_29 = arith.constant 0 : index
    %55 = vector.load %arg4[%c2, %c0_28, %c0_29] : memref<4x8x128xf32, #tpu.memory_space<vmem>>, vector<1x8x128xf32>
    %56 = vector.shape_cast %55 : vector<1x8x128xf32> to vector<8x128xf32>
    %57 = vector.shape_cast %4 : vector<16x128xf32> to vector<2x8x128xf32>
    %cst_30 = arith.constant dense<0.000000e+00> : vector<8x128xf32>
    %58 = vector.multi_reduction <add>, %57, %cst_30 [0] : vector<2x8x128xf32> to vector<8x128xf32>
    %59 = arith.addf %56, %58 : vector<8x128xf32>
    %c2_31 = arith.constant 2 : index
    %c0_32 = arith.constant 0 : index
    %c0_33 = arith.constant 0 : index
    %60 = vector.load %arg4[%c2_31, %c0_32, %c0_33] : memref<4x8x128xf32, #tpu.memory_space<vmem>>, vector<1x8x128xf32>
    %61 = vector.shape_cast %60 : vector<1x8x128xf32> to vector<8x128xf32>
    %62 = vector.shape_cast %59 : vector<8x128xf32> to vector<1x8x128xf32>
    tpu.vector_store %arg4[%c2_31, %c0_32, %c0_33], %62 {strides = array<i32>} : memref<4x8x128xf32, #tpu.memory_space<vmem>>, vector<1x8x128xf32>,
    %c3 = arith.constant 3 : index
    %c0_34 = arith.constant 0 : index
    %c0_35 = arith.constant 0 : index
    %63 = vector.load %arg4[%c3, %c0_34, %c0_35] : memref<4x8x128xf32, #tpu.memory_space<vmem>>, vector<1x8x128xf32>
    %64 = vector.shape_cast %63 : vector<1x8x128xf32> to vector<8x128xf32>
    %65 = vector.shape_cast %37 : vector<16x128xf32> to vector<2x8x128xf32>
    %cst_36 = arith.constant dense<0.000000e+00> : vector<8x128xf32>
    %66 = vector.multi_reduction <add>, %65, %cst_36 [0] : vector<2x8x128xf32> to vector<8x128xf32>
    %67 = arith.addf %64, %66 : vector<8x128xf32>
    %c3_37 = arith.constant 3 : index
    %c0_38 = arith.constant 0 : index
    %c0_39 = arith.constant 0 : index
    %68 = vector.load %arg4[%c3_37, %c0_38, %c0_39] : memref<4x8x128xf32, #tpu.memory_space<vmem>>, vector<1x8x128xf32>
    %69 = vector.shape_cast %68 : vector<1x8x128xf32> to vector<8x128xf32>
    %70 = vector.shape_cast %67 : vector<8x128xf32> to vector<1x8x128xf32>
    tpu.vector_store %arg4[%c3_37, %c0_38, %c0_39], %70 {strides = array<i32>} : memref<4x8x128xf32, #tpu.memory_space<vmem>>, vector<1x8x128xf32>,
    return
  }
  func.func @transform_0(%arg0: i32, %arg1: i32) -> (i32, i32) {
    %c1_i32 = arith.constant 1 : i32
    %0 = arith.muli %arg0, %c1_i32 : i32
    %1 = arith.addi %0, %arg1 : i32
    %c0_i32 = arith.constant 0 : i32
    %c0_i32_0 = arith.constant 0 : i32
    return %1, %c0_i32 : i32, i32
  }
  func.func @transform_1(%arg0: i32, %arg1: i32) -> (i32, i32) {
    %c1_i32 = arith.constant 1 : i32
    %0 = arith.muli %arg0, %c1_i32 : i32
    %1 = arith.addi %0, %arg1 : i32
    %c0_i32 = arith.constant 0 : i32
    %c0_i32_0 = arith.constant 0 : i32
    return %1, %c0_i32 : i32, i32
  }
  func.func @transform_2(%arg0: i32, %arg1: i32) -> (i32, i32, i32) {
    %c0_i32 = arith.constant 0 : i32
    %c0_i32_0 = arith.constant 0 : i32
    %c0_i32_1 = arith.constant 0 : i32
    return %arg0, %c0_i32, %c0_i32_0 : i32, i32, i32
  }
}

</mosaic_0001>

<bundles_post_ra>
// kernel: tpu_custom_call.1
= control target key start
LH: loop header
LB: loop body
LE: loop exit
PB: predicated region body
PF: predicated region fallthrough
CT: control target
= control target key end

     0   :  { %7 = vsyncpa [#allocation3], 0  ;;  %s338_s0 = inlined_call_operand.hbm [shape: f32[16,128], index: 0, kind: input, shape index: {}]   ;;  %s339_s1 = inlined_call_operand.hbm [shape: f32[16,128], index: 1, kind: input, shape index: {}]   ;;  %s340_s2 = inlined_call_operand.hbm [shape: f32[4,8,128], index: 2, kind: output, shape index: {}]  }
   0x1   :  { %8 = vsyncpa [#allocation6], 0 }
   0x2   :  { %9 = vsyncpa [#allocation4], 0  ;;  %s255_s9 = smov [#allocation2]   ;;  %s183_s13 = scalar_lea.hbm %s338_s0, 256 }
   0x3   :  { %s19_s10 = sshll.u32 %s255_s9, 4  ;;  %p184_p0 = scmp.ne.s32.totalorder %s338_s0, %s183_s13  ;;  %s20_s10 = int_to_ptr.vmem [resolvable:$true] %s19_s10 }
   0x4   :  { %p187_p1 = scmp.lt.u32.totalorder %s183_s13, %s338_s0 }
   0x6   :  { %p189_p2 = pnand %p187_p1, %p184_p0 }
   0x8   :  { %192 = shalt.err (!%p189_p2)
}
   0x9   :  { %s193_s18 = scalar_lea.vmem %s20_s10, 256  ;;  %p198_p4 = scmp.lt.s32.totalorder %s20_s10, %s20_s10 }
   0xa   :  { %p194_p3 = scmp.ne.s32.totalorder %s20_s10, %s193_s18  ;;  %p199_p5 = scmp.lt.s32.totalorder %s193_s18, %s193_s18 }
   0xc   :  { %p200_p6 = por %p199_p5, %p198_p4 }
   0xe   :  { %p201_p7 = pnand %p200_p6, %p194_p3 }
  0x10   :  { %204 = shalt.err (!%p201_p7)
}
  0x11   :  { %s256_s19 = smov 128   ;;  %s257_s20 = smov 8  }
  0x12   :  { %25 = dma.hbm_to_vmem [thread:$0]  %s338_s0, 256, %s20_s10, [#allocation3], %s256_s19, %s256_s19, %s257_s20  }
  0x13   :  { %s258_s23 = smov [#allocation5]   ;;  %s205_s27 = scalar_lea.hbm %s339_s1, 256 }
  0x14   :  { %s35_s24 = sshll.u32 %s258_s23, 4  ;;  %p206_p8 = scmp.ne.s32.totalorder %s339_s1, %s205_s27  ;;  %s36_s24 = int_to_ptr.vmem [resolvable:$true] %s35_s24 }
  0x15   :  { %p209_p9 = scmp.lt.u32.totalorder %s205_s27, %s339_s1 }
  0x17   :  { %p211_p10 = pnand %p209_p9, %p206_p8 }
  0x19   :  { %214 = shalt.err (!%p211_p10)
}
  0x1a   :  { %s215_s4 = scalar_lea.vmem %s36_s24, 256  ;;  %p220_p12 = scmp.lt.s32.totalorder %s36_s24, %s36_s24 }
  0x1b   :  { %p216_p11 = scmp.ne.s32.totalorder %s36_s24, %s215_s4  ;;  %p221_p13 = scmp.lt.s32.totalorder %s215_s4, %s215_s4 }
  0x1d   :  { %p222_p0 = por %p221_p13, %p220_p12 }
  0x1f   :  { %p223_p1 = pnand %p222_p0, %p216_p11 }
  0x21   :  { %226 = shalt.err (!%p223_p1)
}
  0x22   :  { %41 = dma.hbm_to_vmem [thread:$0]  %s339_s1, 256, %s36_s24, [#allocation6], %s256_s19, %s256_s19, %s257_s20  }
  0x23   :  { %249 = dma.done.wait [#allocation3], 256  }
  0x24   :  { %250 = vsyncadd [#allocation3], 4294967040 }
  0x25   :  { %251 = dma.done.wait [#allocation6], 256  }
  0x26   :  { %252 = vsyncadd [#allocation6], 4294967040  ;;  %v60_v0 = vld [vmem:[#allocation2] sm:$0xff]  ;;  %v305_v1 = vld [vmem:[#allocation2 + $0x8] sm:$0xff]  ;;  %s259_s1 = smov [#allocation7]  }
  0x27   :  { %v307_v2 = vld [vmem:[#allocation5] sm:$0xff]  ;;  %v309_v3 = vld [vmem:[#allocation5 + $0x8] sm:$0xff]  ;;  %v64_v4 = vand.u32 2147483647, %v60_v0  ;;  %v65_v5 = vand.u32 2147483647, %v305_v1 }
  0x28   :  { %v139_v6 = vadd.f32 %v309_v3, %v307_v2  ;;  %vm110_vm0 = vcmp.ge.f32.partialorder %v60_v0, 0.0  ;;  %vm111_vm1 = vcmp.ge.f32.partialorder %v305_v1, 0.0  ;;  %v72_v27 = vmax.f32 %v60_v0, 0.0  ;;  %s152_s6 = sshll.u32 %s259_s1, 4  ;;  %s153_s6 = int_to_ptr.vmem [resolvable:$true] %s152_s6 }
  0x29   :  { %v66_v7 = vsub.f32 0.0, %v64_v4  ;;  %v67_v8 = vsub.f32 0.0, %v65_v5  ;;  %v73_v31 = vmax.f32 %v305_v1, 0.0  ;;  %v118_v45 = vsub.f32 1.0, %v307_v2  ;;  %s227_s7 = scalar_lea.vmem %s153_s6, 512  ;;  %p232_p3 = scmp.lt.s32.totalorder %s153_s6, %s153_s6 }
  0x2a   :  { %141 = vst [vmem:[#allocation7 + $0x10] sm:$0xff] %v139_v6  ;;  %v119_v48 = vsub.f32 1.0, %v309_v3  ;;  %p228_p2 = scmp.ne.s32.totalorder %s153_s6, %s227_s7  ;;  %p233_p4 = scmp.lt.s32.totalorder %s227_s7, %s227_s7 }
  0x2b   :  { %v68_v9 = vmul.f32 1.442695, %v66_v7  ;;  %v70_v10 = vmul.f32 1.442695, %v67_v8 }
  0x2c   :  { %p234_p5 = por %p233_p4, %p232_p3 }
  0x2d   :  { %171 = vpow2.f32 %v68_v9 }
  0x2e   :  { %173 = vpow2.f32 %v70_v10  ;;  %p235_p6 = pnand %p234_p5, %p228_p2 }
  0x37   :  { %v172_v11 = vpop.eup %171 }
  0x38   :  { %v174_v12 = vpop.eup %173  ;;  %v74_v13 = vadd.f32 1.0, %v172_v11  ;;  %v77_v15 = vmul.f32 -0.5, %v172_v11  ;;  %v80_v18 = vand.u32 2147483647, %v172_v11 }
  0x39   :  { %v83_v14 = vadd.f32 1.0, %v174_v12  ;;  %v86_v16 = vmul.f32 -0.5, %v174_v12  ;;  %v89_v20 = vand.u32 2147483647, %v174_v12 }
  0x3a   :  { %175 = vrcp.f32 %v74_v13  ;;  %v78_v17 = vadd.f32 1.0, %v77_v15  ;;  %vm81_vm2 = vcmp.lt.f32.partialorder %v80_v18, 0.0004427343 }
  0x3b   :  { %177 = vrcp.f32 %v83_v14  ;;  %v87_v19 = vadd.f32 1.0, %v86_v16  ;;  %vm90_vm3 = vcmp.lt.f32.partialorder %v89_v20, 0.0004427343 }
  0x3c   :  { %179 = vlog2.f32 %v74_v13  ;;  %v79_v24 = vmul.f32 %v172_v11, %v78_v17 }
  0x3d   :  { %181 = vlog2.f32 %v83_v14  ;;  %v88_v28 = vmul.f32 %v174_v12, %v87_v19 }
  0x44   :  { %v176_v21 = vpop.eup %175 }
  0x45   :  { %v178_v22 = vpop.eup %177  ;;  %v112_v23 = vsub.f32 1.0, %v176_v21 }
  0x46   :  { %v180_v25 = vpop.eup %179  ;;  %v113_v26 = vsub.f32 1.0, %v178_v22 }
  0x47   :  { %v182_v29 = vpop.eup %181  ;;  %v114_v30 = vsel %vm110_vm0, %v176_v21, %v112_v23  ;;  %v76_v32 = vmul.f32 0.6931472, %v180_v25 }
  0x48   :  { %v115_v33 = vsel %vm111_vm1, %v178_v22, %v113_v26  ;;  %v127_v34 = vmul.f32 %v114_v30, %v307_v2  ;;  %v85_v35 = vmul.f32 0.6931472, %v182_v29 }
  0x49   :  { %v128_v36 = vmul.f32 %v115_v33, %v309_v3  ;;  %v134_v37 = vadd.f32 %v115_v33, %v114_v30  ;;  %v82_v38 = vsel %vm81_vm2, %v79_v24, %v76_v32 }
  0x4a   :  { %v91_v39 = vsel %vm90_vm3, %v88_v28, %v85_v35  ;;  %v92_v40 = vadd.f32 %v82_v38, %v72_v27 }
  0x4b   :  { %v129_v41 = vadd.f32 %v128_v36, %v127_v34  ;;  %v93_v42 = vadd.f32 %v91_v39, %v73_v31  ;;  %136 = vst [vmem:[#allocation7 + $0x8] sm:$0xff] %v134_v37 }
  0x4c   :  { %v94_v43 = vsub.f32 %v92_v40, %v60_v0  ;;  %v100_v44 = vmin.f32 %v92_v40, 100.0 }
  0x4d   :  { %v95_v46 = vsub.f32 %v93_v42, %v305_v1  ;;  %v101_v47 = vmin.f32 %v93_v42, 100.0  ;;  %131 = vst [vmem:[#allocation7] sm:$0xff] %v129_v41 }
  0x4e   :  { %v96_v49 = vmin.f32 %v94_v43, 100.0  ;;  %v102_v50 = vsub.f32 0.0, %v100_v44 }
  0x4f   :  { %v97_v51 = vmin.f32 %v95_v46, 100.0  ;;  %v103_v52 = vsub.f32 0.0, %v101_v47 }
  0x50   :  { %v98_v53 = vsub.f32 0.0, %v96_v49  ;;  %v120_v54 = vmul.f32 %v118_v45, %v102_v50 }
  0x51   :  { %v99_v55 = vsub.f32 0.0, %v97_v51  ;;  %v121_v56 = vmul.f32 %v119_v48, %v103_v52 }
  0x52   :  { %v116_v57 = vmul.f32 %v98_v53, %v307_v2 }
  0x53   :  { %v117_v58 = vmul.f32 %v99_v55, %v309_v3 }
  0x54   :  { %v122_v59 = vadd.f32 %v120_v54, %v116_v57 }
  0x55   :  { %v123_v60 = vadd.f32 %v121_v56, %v117_v58 }
  0x56   :  { %v124_v61 = vsub.f32 0.0, %v122_v59 }
  0x57   :  { %v125_v62 = vsub.f32 0.0, %v123_v60 }
  0x59   :  { %v144_v63 = vadd.f32 %v125_v62, %v124_v61 }
  0x5b   :  { %146 = vst [vmem:[#allocation7 + $0x18] sm:$0xff] %v144_v63 }
  0x5c   :  { %238 = shalt.err (!%p235_p6)
}
  0x5d   :  { %s239_s10 = scalar_lea.hbm %s340_s2, 512 }
  0x5e   :  { %p240_p7 = scmp.ne.s32.totalorder %s340_s2, %s239_s10  ;;  %p243_p8 = scmp.lt.u32.totalorder %s239_s10, %s340_s2 }
  0x60   :  { %p245_p9 = pnand %p243_p8, %p240_p7 }
  0x62   :  { %248 = shalt.err (!%p245_p9)
}
  0x63   :  { %158 = dma.vmem_to_hbm [thread:$0]  %s153_s6, 512, %s340_s2, [#allocation4], %s256_s19, %s256_s19, %s257_s20  }
  0x64   :  { %253 = dma.done.wait [#allocation4], 512  }
  0x65   :  { %254 = vsyncadd [#allocation4], 4294966784 }
  0x66   :  { %162 = vsyncpa [#allocation3], 1 }
  0x67   :  { %163 = vsyncpa [#allocation6], 1 }
  0x68   :  { %164 = vsyncpa [#allocation4], 1 }

</bundles_post_ra>
